<compile_context>
chip_gen: v6e
topology: v6e:2x2x1
jax: 0.10.0
libtpu: 0.0.40
codegen_flags: <defaults>
</compile_context>

<pallas_src>
import jax
import jax.numpy as jnp
import numpy as np
from jax.experimental import pallas as pl
from jax.experimental.pallas import tpu as pltpu

LANE = 128
SUBLANE = 8


def _round_up(x, m):
    return ((x + m - 1) // m) * m


def _hardswish(x):
    # relu6(x + 3) * (1/6) * x
    return jnp.clip(x + 3.0, 0.0, 6.0) * (1.0 / 6.0) * x


def actor_kernel(s_ref,
                 w0_ref, b0_ref,     # Linear(state_dim, mid)  (padded to H1 lanes)
                 wx1_ref, b1_ref,    # packed RHS for x1: [W1 | W2_top | W3_a]
                 wh1_ref, b2_ref,    # packed RHS for h1: [W2_bot | W3_b]
                 wh2_ref, b3_ref,    # RHS for h2: W3_c
                 o_ref):
    H1 = b1_ref.shape[1]             # padded width of x1 / h1
    H2 = b2_ref.shape[1]             # padded width of h2 (2*mid rounded up)

    # Linear + ReLU (pad lanes stay exactly 0: zero weight cols, zero bias).
    s = s_ref[...].astype(jnp.bfloat16)
    x1 = jnp.maximum(
        jnp.dot(s, w0_ref[...], preferred_element_type=jnp.float32) + b0_ref[...],
        0.0)

    # One wide matmul for everything fed by x1.
    z1 = jnp.dot(x1.astype(jnp.bfloat16), wx1_ref[...],
                 preferred_element_type=jnp.float32)
    h1 = _hardswish(z1[:, :H1] + b1_ref[...])                 # DenseNet.dense1

    # One wide matmul for everything fed by h1.
    z2 = jnp.dot(h1.astype(jnp.bfloat16), wh1_ref[...],
                 preferred_element_type=jnp.float32)
    h2 = _hardswish(z1[:, H1:H1 + H2] + z2[:, :H2] + b2_ref[...])   # dense2 on [x1,h1]

    # Last block of the output head, then combine all head partials + Tanh.
    z3 = jnp.dot(h2.astype(jnp.bfloat16), wh2_ref[...],
                 preferred_element_type=jnp.float32)
    o_ref[...] = jnp.tanh(z1[:, H1 + H2:] + z2[:, H2:] + z3 + b3_ref[...])


def pack_params(params):
    """Split / pad / pack the original-layout f32 weights for the kernel.

    Input weights are (in_features, out_features) (i.e. W.T of nn.Linear),
    biases are (1, out_features).  Returned weights are bf16, biases f32.
    """
    (w0, b0, w1, b1, w2, b2, w3, b3) = params
    state_dim, mid = w0.shape
    act = w3.shape[1]
    H1 = _round_up(mid, LANE)          # padded width of x1 / h1
    H2 = _round_up(2 * mid, LANE)      # padded width of h2
    AO = _round_up(act, LANE)          # padded output width (lane-dense store)

    w0p = jnp.zeros((state_dim, H1), jnp.float32).at[:, :mid].set(w0)
    b0p = jnp.zeros((1, H1), jnp.float32).at[:, :mid].set(b0)

    # x1 feeds: dense1 (W1), top half of dense2 (W2[:mid]), head block a (W3[:mid])
    wx1 = jnp.zeros((H1, H1 + H2 + AO), jnp.float32)
    wx1 = wx1.at[:mid, :mid].set(w1)
    wx1 = wx1.at[:mid, H1:H1 + 2 * mid].set(w2[:mid, :])
    wx1 = wx1.at[:mid, H1 + H2:H1 + H2 + act].set(w3[:mid, :])
    b1p = jnp.zeros((1, H1), jnp.float32).at[:, :mid].set(b1)

    # h1 feeds: bottom half of dense2 (W2[mid:]), head block b (W3[mid:2mid])
    wh1 = jnp.zeros((H1, H2 + AO), jnp.float32)
    wh1 = wh1.at[:mid, :2 * mid].set(w2[mid:, :])
    wh1 = wh1.at[:mid, H2:H2 + act].set(w3[mid:2 * mid, :])
    b2p = jnp.zeros((1, H2), jnp.float32).at[:, :2 * mid].set(b2)

    # h2 feeds: head block c (W3[2mid:])
    wh2 = jnp.zeros((H2, AO), jnp.float32).at[:2 * mid, :act].set(w3[2 * mid:, :])
    b3p = jnp.zeros((1, AO), jnp.float32).at[:, :act].set(b3)

    bf = jnp.bfloat16
    return (w0p.astype(bf), b0p, wx1.astype(bf), b1p,
            wh1.astype(bf), b2p, wh2.astype(bf), b3p)


def actor_forward(s, packed, action_dim, *, tile_b=256):
    (w0p, b0p, wx1, b1p, wh1, b2p, wh2, b3p) = packed
    B, state_dim = s.shape
    AO = b3p.shape[1]

    # Batch tile: up to 256 rows per grid step; small batches use a single
    # sublane-aligned tile with no padding waste.
    tile_b = min(tile_b, _round_up(max(B, SUBLANE), SUBLANE))
    Bp = _round_up(max(B, tile_b), tile_b)
    if Bp != B:
        s = jnp.pad(s, ((0, Bp - B), (0, 0)))
    grid = (Bp // tile_b,)

    def resident(arr):
        # Weights/biases: full block, constant index_map -> stay resident
        # across batch-grid steps.
        return pl.BlockSpec(arr.shape, lambda i: (0, 0))

    out = pl.pallas_call(
        actor_kernel,
        out_shape=jax.ShapeDtypeStruct((Bp, AO), jnp.float32),
        grid=grid,
        in_specs=[
            pl.BlockSpec((tile_b, state_dim), lambda i: (i, 0)),
            resident(w0p), resident(b0p),
            resident(wx1), resident(b1p),
            resident(wh1), resident(b2p),
            resident(wh2), resident(b3p),
        ],
        out_specs=pl.BlockSpec((tile_b, AO), lambda i: (i, 0)),
        compiler_params=pltpu.CompilerParams(
            dimension_semantics=("parallel",)),
    )(s, w0p, b0p, wx1, b1p, wh1, b2p, wh2, b3p)

    return out[:B, :action_dim]


def _orthogonal(key, in_dim, out_dim, gain):
    """Deterministic orthogonal init, returned as (in_dim, out_dim)."""
    n = max(in_dim, out_dim)
    a = jax.random.normal(key, (n, n), dtype=jnp.float32)
    q, r = jnp.linalg.qr(a)
    d = jnp.sign(jnp.diag(r))
    d = jnp.where(d == 0, 1.0, d)              # avoid zeroed columns
    q = q * d
    return (gain * q[:in_dim, :out_dim]).astype(jnp.float32)


def make_params(key, state_dim, mid_dim, action_dim):
    k0, k1, k2, k3 = jax.random.split(key, 4)
    w0 = _orthogonal(k0, state_dim, mid_dim, 1.0)        # net[0]
    w1 = _orthogonal(k1, mid_dim, mid_dim, 1.0)          # DenseNet.dense1, std=1.0
    w2 = _orthogonal(k2, 2 * mid_dim, 2 * mid_dim, 1.0)  # DenseNet.dense2, std=1.0
    w3 = _orthogonal(k3, 4 * mid_dim, action_dim, 0.01)  # output head, std=0.01
    b0 = jnp.zeros((1, mid_dim), jnp.float32)
    b1 = jnp.zeros((1, mid_dim), jnp.float32)
    b2 = jnp.zeros((1, 2 * mid_dim), jnp.float32)
    b3 = jnp.zeros((1, action_dim), jnp.float32)
    return (w0, b0, w1, b1, w2, b2, w3, b3)


def actor_reference(s, params):
    """Pure-JAX f32 reference of the same forward (matches the PyTorch module)."""
    (w0, b0, w1, b1, w2, b2, w3, b3) = params
    x1 = jnp.maximum(s @ w0 + b0, 0.0)
    x2 = jnp.concatenate([x1, _hardswish(x1 @ w1 + b1)], axis=1)
    x3 = jnp.concatenate([x2, _hardswish(x2 @ w2 + b2)], axis=1)
    return jnp.tanh(x3 @ w3 + b3)


if __name__ == "__main__":
    # TODO(synk): noise_std != 0 path (add_noise) uses torch.normal/rand RNG; only
    # the deterministic noise_std == 0.0 forward is implemented here.
    state_dim, mid_dim, action_dim, batch = 16, 32, 4, 8

    key = jax.random.PRNGKey(0)
    k_param, k_state = jax.random.split(key)
    params = make_params(k_param, state_dim, mid_dim, action_dim)
    packed = pack_params(params)
    s = jax.random.normal(k_state, (batch, state_dim), dtype=jnp.float32)

    out = jax.block_until_ready(actor_forward(s, packed, action_dim))

    ref = actor_reference(s, params)
    # bf16 matmul inputs (f32 accumulation) vs the f32 reference -> loose tol.
    np.testing.assert_allclose(np.asarray(out), np.asarray(ref),
                               rtol=2e-2, atol=2e-2)

    print("KERNEL_OK")
</pallas_src>

<mosaic_0001>
module attributes {stable_mosaic.version = 11 : i64} {
  func.func @actor_kernel(%arg0: i32, %arg1: memref<8x16xf32, #tpu.memory_space<vmem>>, %arg2: memref<16x128xbf16, #tpu.memory_space<vmem>>, %arg3: memref<1x128xf32, #tpu.memory_space<vmem>>, %arg4: memref<128x384xbf16, #tpu.memory_space<vmem>>, %arg5: memref<1x128xf32, #tpu.memory_space<vmem>>, %arg6: memref<128x256xbf16, #tpu.memory_space<vmem>>, %arg7: memref<1x128xf32, #tpu.memory_space<vmem>>, %arg8: memref<128x128xbf16, #tpu.memory_space<vmem>>, %arg9: memref<1x128xf32, #tpu.memory_space<vmem>>, %arg10: memref<8x128xf32, #tpu.memory_space<vmem>>) attributes {dimension_semantics = [#tpu.dimension_semantics<parallel>], iteration_bounds = array<i64: 1>, scalar_prefetch = 0 : i64, scratch_operands = 0 : i64, tpu.core_type = #tpu.core_type<tc>, window_params = [{transform_indices = @transform_0, window_bounds = array<i64: 8, 16>}, {pipeline_mode = #tpu.pipeline_mode<synchronous>, transform_indices = @transform_1, window_bounds = array<i64: 16, 128>}, {pipeline_mode = #tpu.pipeline_mode<synchronous>, transform_indices = @transform_2, window_bounds = array<i64: 1, 128>}, {pipeline_mode = #tpu.pipeline_mode<synchronous>, transform_indices = @transform_3, window_bounds = array<i64: 128, 384>}, {pipeline_mode = #tpu.pipeline_mode<synchronous>, transform_indices = @transform_4, window_bounds = array<i64: 1, 128>}, {pipeline_mode = #tpu.pipeline_mode<synchronous>, transform_indices = @transform_5, window_bounds = array<i64: 128, 256>}, {pipeline_mode = #tpu.pipeline_mode<synchronous>, transform_indices = @transform_6, window_bounds = array<i64: 1, 128>}, {pipeline_mode = #tpu.pipeline_mode<synchronous>, transform_indices = @transform_7, window_bounds = array<i64: 128, 128>}, {pipeline_mode = #tpu.pipeline_mode<synchronous>, transform_indices = @transform_8, window_bounds = array<i64: 1, 128>}, {transform_indices = @transform_9, window_bounds = array<i64: 8, 128>}]} {
    %c0 = arith.constant 0 : index
    %c0_0 = arith.constant 0 : index
    %0 = vector.load %arg1[%c0, %c0_0] : memref<8x16xf32, #tpu.memory_space<vmem>>, vector<8x16xf32>
    %1 = arith.truncf %0 : vector<8x16xf32> to vector<8x16xbf16>
    %c0_1 = arith.constant 0 : index
    %c0_2 = arith.constant 0 : index
    %2 = vector.load %arg2[%c0_1, %c0_2] : memref<16x128xbf16, #tpu.memory_space<vmem>>, vector<16x128xbf16>
    %cst = arith.constant dense<0.000000e+00> : vector<8x128xf32>
    %3 = tpu.matmul %1, %2, %cst {dimension_numbers = #tpu.dot_dimension_numbers<[1], [0], [0], [1], [0, 0, 1, 1], [], []>} : vector<8x16xbf16>, vector<16x128xbf16>, vector<8x128xf32> -> vector<8x128xf32>
    %c0_3 = arith.constant 0 : index
    %c0_4 = arith.constant 0 : index
    %4 = vector.load %arg3[%c0_3, %c0_4] : memref<1x128xf32, #tpu.memory_space<vmem>>, vector<1x128xf32>
    %5 = vector.broadcast %4 : vector<1x128xf32> to vector<8x128xf32>
    %6 = arith.addf %3, %5 : vector<8x128xf32>
    %cst_5 = arith.constant 0.000000e+00 : f32
    %7 = vector.broadcast %cst_5 : f32 to vector<8x128xf32>
    %8 = arith.maximumf %6, %7 : vector<8x128xf32>
    %9 = arith.truncf %8 : vector<8x128xf32> to vector<8x128xbf16>
    %c0_6 = arith.constant 0 : index
    %c0_7 = arith.constant 0 : index
    %10 = vector.load %arg4[%c0_6, %c0_7] : memref<128x384xbf16, #tpu.memory_space<vmem>>, vector<128x384xbf16>
    %cst_8 = arith.constant dense<0.000000e+00> : vector<8x384xf32>
    %11 = tpu.matmul %9, %10, %cst_8 {dimension_numbers = #tpu.dot_dimension_numbers<[1], [0], [0], [1], [0, 0, 1, 1], [], []>} : vector<8x128xbf16>, vector<128x384xbf16>, vector<8x384xf32> -> vector<8x384xf32>
    %12 = vector.extract_strided_slice %11 {offsets = [0, 0], sizes = [8, 128], strides = [1, 1]} : vector<8x384xf32> to vector<8x128xf32>
    %c0_9 = arith.constant 0 : index
    %c0_10 = arith.constant 0 : index
    %13 = vector.load %arg5[%c0_9, %c0_10] : memref<1x128xf32, #tpu.memory_space<vmem>>, vector<1x128xf32>
    %14 = vector.broadcast %13 : vector<1x128xf32> to vector<8x128xf32>
    %15 = arith.addf %12, %14 : vector<8x128xf32>
    %cst_11 = arith.constant 3.000000e+00 : f32
    %16 = vector.broadcast %cst_11 : f32 to vector<8x128xf32>
    %17 = arith.addf %15, %16 : vector<8x128xf32>
    %cst_12 = arith.constant 0.000000e+00 : f32
    %cst_13 = arith.constant 6.000000e+00 : f32
    %18 = vector.broadcast %cst_12 : f32 to vector<8x128xf32>
    %19 = arith.maximumf %18, %17 : vector<8x128xf32>
    %20 = vector.broadcast %cst_13 : f32 to vector<8x128xf32>
    %21 = arith.minimumf %20, %19 : vector<8x128xf32>
    %cst_14 = arith.constant 0.166666672 : f32
    %22 = vector.broadcast %cst_14 : f32 to vector<8x128xf32>
    %23 = arith.mulf %21, %22 : vector<8x128xf32>
    %24 = arith.mulf %23, %15 : vector<8x128xf32>
    %25 = arith.truncf %24 : vector<8x128xf32> to vector<8x128xbf16>
    %c0_15 = arith.constant 0 : index
    %c0_16 = arith.constant 0 : index
    %26 = vector.load %arg6[%c0_15, %c0_16] : memref<128x256xbf16, #tpu.memory_space<vmem>>, vector<128x256xbf16>
    %cst_17 = arith.constant dense<0.000000e+00> : vector<8x256xf32>
    %27 = tpu.matmul %25, %26, %cst_17 {dimension_numbers = #tpu.dot_dimension_numbers<[1], [0], [0], [1], [0, 0, 1, 1], [], []>} : vector<8x128xbf16>, vector<128x256xbf16>, vector<8x256xf32> -> vector<8x256xf32>
    %28 = vector.extract_strided_slice %11 {offsets = [0, 128], sizes = [8, 128], strides = [1, 1]} : vector<8x384xf32> to vector<8x128xf32>
    %29 = vector.extract_strided_slice %27 {offsets = [0, 0], sizes = [8, 128], strides = [1, 1]} : vector<8x256xf32> to vector<8x128xf32>
    %30 = arith.addf %28, %29 : vector<8x128xf32>
    %c0_18 = arith.constant 0 : index
    %c0_19 = arith.constant 0 : index
    %31 = vector.load %arg7[%c0_18, %c0_19] : memref<1x128xf32, #tpu.memory_space<vmem>>, vector<1x128xf32>
    %32 = vector.broadcast %31 : vector<1x128xf32> to vector<8x128xf32>
    %33 = arith.addf %30, %32 : vector<8x128xf32>
    %cst_20 = arith.constant 3.000000e+00 : f32
    %34 = vector.broadcast %cst_20 : f32 to vector<8x128xf32>
    %35 = arith.addf %33, %34 : vector<8x128xf32>
    %cst_21 = arith.constant 0.000000e+00 : f32
    %cst_22 = arith.constant 6.000000e+00 : f32
    %36 = vector.broadcast %cst_21 : f32 to vector<8x128xf32>
    %37 = arith.maximumf %36, %35 : vector<8x128xf32>
    %38 = vector.broadcast %cst_22 : f32 to vector<8x128xf32>
    %39 = arith.minimumf %38, %37 : vector<8x128xf32>
    %cst_23 = arith.constant 0.166666672 : f32
    %40 = vector.broadcast %cst_23 : f32 to vector<8x128xf32>
    %41 = arith.mulf %39, %40 : vector<8x128xf32>
    %42 = arith.mulf %41, %33 : vector<8x128xf32>
    %43 = arith.truncf %42 : vector<8x128xf32> to vector<8x128xbf16>
    %c0_24 = arith.constant 0 : index
    %c0_25 = arith.constant 0 : index
    %44 = vector.load %arg8[%c0_24, %c0_25] : memref<128x128xbf16, #tpu.memory_space<vmem>>, vector<128x128xbf16>
    %cst_26 = arith.constant dense<0.000000e+00> : vector<8x128xf32>
    %45 = tpu.matmul %43, %44, %cst_26 {dimension_numbers = #tpu.dot_dimension_numbers<[1], [0], [0], [1], [0, 0, 1, 1], [], []>} : vector<8x128xbf16>, vector<128x128xbf16>, vector<8x128xf32> -> vector<8x128xf32>
    %46 = vector.extract_strided_slice %11 {offsets = [0, 256], sizes = [8, 128], strides = [1, 1]} : vector<8x384xf32> to vector<8x128xf32>
    %47 = vector.extract_strided_slice %27 {offsets = [0, 128], sizes = [8, 128], strides = [1, 1]} : vector<8x256xf32> to vector<8x128xf32>
    %48 = arith.addf %46, %47 : vector<8x128xf32>
    %49 = arith.addf %48, %45 : vector<8x128xf32>
    %c0_27 = arith.constant 0 : index
    %c0_28 = arith.constant 0 : index
    %50 = vector.load %arg9[%c0_27, %c0_28] : memref<1x128xf32, #tpu.memory_space<vmem>>, vector<1x128xf32>
    %51 = vector.broadcast %50 : vector<1x128xf32> to vector<8x128xf32>
    %52 = arith.addf %49, %51 : vector<8x128xf32>
    %53 = math.tanh %52 : vector<8x128xf32>
    %c0_29 = arith.constant 0 : index
    %c0_30 = arith.constant 0 : index
    %54 = vector.load %arg10[%c0_29, %c0_30] : memref<8x128xf32, #tpu.memory_space<vmem>>, vector<8x128xf32>
    tpu.vector_store %arg10[%c0_29, %c0_30], %53 {strides = array<i32>} : memref<8x128xf32, #tpu.memory_space<vmem>>, vector<8x128xf32>,
    return
  }
  func.func @transform_0(%arg0: i32) -> (i32, i32) {
    %c0_i32 = arith.constant 0 : i32
    %c0_i32_0 = arith.constant 0 : i32
    return %arg0, %c0_i32 : i32, i32
  }
  func.func @transform_1(%arg0: i32) -> (i32, i32) {
    %c0_i32 = arith.constant 0 : i32
    %c0_i32_0 = arith.constant 0 : i32
    %c0_i32_1 = arith.constant 0 : i32
    return %c0_i32, %c0_i32_0 : i32, i32
  }
  func.func @transform_2(%arg0: i32) -> (i32, i32) {
    %c0_i32 = arith.constant 0 : i32
    %c0_i32_0 = arith.constant 0 : i32
    %c0_i32_1 = arith.constant 0 : i32
    return %c0_i32, %c0_i32_0 : i32, i32
  }
  func.func @transform_3(%arg0: i32) -> (i32, i32) {
    %c0_i32 = arith.constant 0 : i32
    %c0_i32_0 = arith.constant 0 : i32
    %c0_i32_1 = arith.constant 0 : i32
    return %c0_i32, %c0_i32_0 : i32, i32
  }
  func.func @transform_4(%arg0: i32) -> (i32, i32) {
    %c0_i32 = arith.constant 0 : i32
    %c0_i32_0 = arith.constant 0 : i32
    %c0_i32_1 = arith.constant 0 : i32
    return %c0_i32, %c0_i32_0 : i32, i32
  }
  func.func @transform_5(%arg0: i32) -> (i32, i32) {
    %c0_i32 = arith.constant 0 : i32
    %c0_i32_0 = arith.constant 0 : i32
    %c0_i32_1 = arith.constant 0 : i32
    return %c0_i32, %c0_i32_0 : i32, i32
  }
  func.func @transform_6(%arg0: i32) -> (i32, i32) {
    %c0_i32 = arith.constant 0 : i32
    %c0_i32_0 = arith.constant 0 : i32
    %c0_i32_1 = arith.constant 0 : i32
    return %c0_i32, %c0_i32_0 : i32, i32
  }
  func.func @transform_7(%arg0: i32) -> (i32, i32) {
    %c0_i32 = arith.constant 0 : i32
    %c0_i32_0 = arith.constant 0 : i32
    %c0_i32_1 = arith.constant 0 : i32
    return %c0_i32, %c0_i32_0 : i32, i32
  }
  func.func @transform_8(%arg0: i32) -> (i32, i32) {
    %c0_i32 = arith.constant 0 : i32
    %c0_i32_0 = arith.constant 0 : i32
    %c0_i32_1 = arith.constant 0 : i32
    return %c0_i32, %c0_i32_0 : i32, i32
  }
  func.func @transform_9(%arg0: i32) -> (i32, i32) {
    %c0_i32 = arith.constant 0 : i32
    %c0_i32_0 = arith.constant 0 : i32
    return %arg0, %c0_i32 : i32, i32
  }
}

</mosaic_0001>

<bundles_post_ra>
// kernel: tpu_custom_call.1
= control target key start
LH: loop header
LB: loop body
LE: loop exit
PB: predicated region body
PF: predicated region fallthrough
CT: control target
= control target key end

     0   :  { %14 = vsyncpa [#allocation3], 0  ;;  %s1157_s0 = inlined_call_operand.hbm [shape: f32[8,16], index: 0, kind: input, shape index: {}]   ;;  %s1158_s1 = inlined_call_operand.hbm [shape: bf16[16,128], index: 1, kind: input, shape index: {}]   ;;  %s1159_s2 = inlined_call_operand.vmem [shape: f32[1,128], index: 2, kind: input, shape index: {}]   ;;  %s1160_s3 = inlined_call_operand.hbm [shape: bf16[128,384], index: 3, kind: input, shape index: {}]   ;;  %s1161_s4 = inlined_call_operand.vmem [shape: f32[1,128], index: 4, kind: input, shape index: {}]   ;;  %s1162_s5 = inlined_call_operand.hbm [shape: bf16[128,256], index: 5, kind: input, shape index: {}]   ;;  %s1163_s6 = inlined_call_operand.vmem [shape: f32[1,128], index: 6, kind: input, shape index: {}]   ;;  %s1164_s7 = inlined_call_operand.hbm [shape: bf16[128,128], index: 7, kind: input, shape index: {}]   ;;  %s1165_s8 = inlined_call_operand.vmem [shape: f32[1,128], index: 8, kind: input, shape index: {}]   ;;  %s1166_s9 = inlined_call_operand.hbm [shape: f32[8,128], index: 9, kind: output, shape index: {}]  }
   0x1   :  { %15 = vsyncpa [#allocation6], 0 }
   0x2   :  { %16 = vsyncpa [#allocation9], 0 }
   0x3   :  { %17 = vsyncpa [#allocation4], 0  ;;  %s1033_s30 = smov [#allocation5]  }
   0x4   :  { %s33_s10 = sshll.u32 %s1033_s30, 4  ;;  %s34_s10 = int_to_ptr.vmem [resolvable:$true] %s33_s10 }
   0x5   :  { %s913_s11 = scalar_lea.vmem %s34_s10, 128  ;;  %p918_p1 = scmp.lt.s32.totalorder %s34_s10, %s34_s10 }
   0x6   :  { %p914_p0 = scmp.ne.s32.totalorder %s34_s10, %s913_s11  ;;  %p919_p2 = scmp.lt.s32.totalorder %s913_s11, %s913_s11 }
   0x8   :  { %p920_p3 = por %p919_p2, %p918_p1 }
   0xa   :  { %p921_p4 = pnand %p920_p3, %p914_p0 }
   0xc   :  { %924 = shalt.err (!%p921_p4)
}
   0xd   :  { %s1034_s12 = smov 64   ;;  %s1035_s13 = smov 4  }
   0xe   :  { %39 = dma.hbm_to_vmem [thread:$0]  %s1158_s1, 128, %s34_s10, [#allocation6], %s1034_s12, %s1034_s12, %s1035_s13  }
   0xf   :  { %s1036_s16 = smov [#allocation8]  }
  0x10   :  { %s61_s17 = sshll.u32 %s1036_s16, 4  ;;  %s62_s17 = int_to_ptr.vmem [resolvable:$true] %s61_s17 }
  0x11   :  { %s933_s18 = scalar_lea.vmem %s62_s17, 2048  ;;  %p938_p6 = scmp.lt.s32.totalorder %s62_s17, %s62_s17 }
  0x12   :  { %p934_p5 = scmp.ne.s32.totalorder %s62_s17, %s933_s18  ;;  %p939_p7 = scmp.lt.s32.totalorder %s933_s18, %s933_s18 }
  0x14   :  { %p940_p8 = por %p939_p7, %p938_p6 }
  0x16   :  { %p941_p9 = pnand %p940_p8, %p934_p5 }
  0x18   :  { %944 = shalt.err (!%p941_p9)
}
  0x19   :  { %s1037_s19 = smov 128   ;;  %s1038_s20 = smov 8  }
  0x1a   :  { %67 = dma.hbm_to_vmem [thread:$0]  %s1162_s5, 2048, %s62_s17, [#allocation9], %s1037_s19, %s1037_s19, %s1038_s20  }
  0x1b   :  { %s1039_s23 = smov [#allocation2]   ;;  %s1040_s25 = smov [#allocation7]  }
  0x1c   :  { %s24_s24 = sshll.u32 %s1039_s23, 4  ;;  %s47_s1 = sshll.u32 %s1040_s25, 4  ;;  %s25_s24 = int_to_ptr.vmem [resolvable:$true] %s24_s24  ;;  %s48_s1 = int_to_ptr.vmem [resolvable:$true] %s47_s1 }
  0x1d   :  { %s953_s26 = scalar_lea.vmem %s25_s24, 128  ;;  %p958_p11 = scmp.lt.s32.totalorder %s25_s24, %s25_s24 }
  0x1e   :  { %p954_p10 = scmp.ne.s32.totalorder %s25_s24, %s953_s26  ;;  %p959_p12 = scmp.lt.s32.totalorder %s953_s26, %s953_s26 }
  0x20   :  { %p960_p13 = por %p959_p12, %p958_p11 }
  0x22   :  { %p961_p0 = pnand %p960_p13, %p954_p10 }
  0x24   :  { %964 = shalt.err (!%p961_p0)
}
  0x25   :  { %27 = dma.hbm_to_vmem [thread:$0]  %s1157_s0, 128, %s25_s24, [#allocation3]  }
  0x26   :  { %s973_s29 = scalar_lea.vmem %s48_s1, 3072  ;;  %p978_p2 = scmp.lt.s32.totalorder %s48_s1, %s48_s1 }
  0x27   :  { %p974_p1 = scmp.ne.s32.totalorder %s48_s1, %s973_s29  ;;  %p979_p3 = scmp.lt.s32.totalorder %s973_s29, %s973_s29 }
  0x29   :  { %p980_p4 = por %p979_p3, %p978_p2 }
  0x2b   :  { %p981_p5 = pnand %p980_p4, %p974_p1 }
  0x2d   :  { %984 = shalt.err (!%p981_p5)
}
  0x2e   :  { %s1041_s5 = smov 192   ;;  %s1042_s30 = smov 12  }
  0x2f   :  { %53 = dma.hbm_to_vmem [thread:$0]  %s1160_s3, 3072, %s48_s1, [#allocation6], %s1041_s5, %s1041_s5, %s1042_s30  }
  0x30   :  { %s1043_s14 = smov [#allocation10]  }
  0x31   :  { %s75_s15 = sshll.u32 %s1043_s14, 4  ;;  %s76_s15 = int_to_ptr.vmem [resolvable:$true] %s75_s15 }
  0x32   :  { %s993_s16 = scalar_lea.vmem %s76_s15, 1024  ;;  %p998_p7 = scmp.lt.s32.totalorder %s76_s15, %s76_s15 }
  0x33   :  { %p994_p6 = scmp.ne.s32.totalorder %s76_s15, %s993_s16  ;;  %p999_p8 = scmp.lt.s32.totalorder %s993_s16, %s993_s16 }
  0x35   :  { %p1000_p9 = por %p999_p8, %p998_p7 }
  0x37   :  { %p1001_p10 = pnand %p1000_p9, %p994_p6 }
  0x39   :  { %1004 = shalt.err (!%p1001_p10)
}
  0x3a   :  { %81 = dma.hbm_to_vmem [thread:$0]  %s1164_s7, 1024, %s76_s15, [#allocation9], %s1034_s12, %s1034_s12, %s1035_s13  }
  0x3b   :  { %1025 = dma.done.wait [#allocation3], 128  }
  0x3c   :  { %1026 = vsyncadd [#allocation3], 4294967168 }
  0x3d   :  { %1027 = dma.done.wait [#allocation6], 3200  }
  0x3e   :  { %1028 = vsyncadd [#allocation6], 4294964096 }
  0x3f   :  { %1029 = dma.done.wait [#allocation9], 3072  }
  0x40   :  { %1030 = vsyncadd [#allocation9], 4294964224  ;;  %v1044_v0 = vmov 0.0   ;;  %vm1045_vm0 = vmmov 0   ;;  %v838_v1 = vld [vmem:[#allocation5] sm:$0xff]   ;;  %v100_v2 = vld [vmem:[#allocation2] sm:$0xff] }
  0x41   :  { %777 = vmatprep.subr.bf16.mxu0 %v1044_v0  ;;  %779 = vmatprep.mubr.msk.bf16.mxu0 %vm1045_vm0, %v1044_v0  ;;  %vm117_vm1 = vcmask 130048   ;;  %v101_v3 = vpack.c.bf16 %v100_v2, %v100_v2  ;;  %v839_v4 = vld [vmem:[#allocation7 + $0xac] ss:$12 sps:$4 sm:$0xff]   ;;  %v841_v5 = vld [vmem:[#allocation7 + $0xa8] ss:$12 sps:$4 sm:$0xff]   ;;  %v1046_v28 = vmov 0  }
  0x42   :  { %778 = vmatpush3.bf16.msra.mxu0 %v838_v1  ;;  %v842_v6 = vld [vmem:[#allocation7 + $0xb0] ss:$12 sps:$4 sm:$0xff]   ;;  %323 = vmatprep.subr.bf16.mxu1 %v839_v4  ;;  %v843_v7 = vld [vmem:[#allocation7 + $0x94] ss:$12 sps:$4 sm:$0xff]   ;;  %v846_v9 = vld [vmem:[#allocation7 + $0x98] ss:$12 sps:$4 sm:$0xff]  }
  0x43   :  { %783 = vmatprep.subr.bf16.mxu0 %v1044_v0  ;;  %v845_v8 = vld [vmem:[#allocation7 + $0x90] ss:$12 sps:$4 sm:$0xff]   ;;  %324 = vmatpush1.bf16.msra.mxu1 %v841_v5  ;;  %v849_v11 = vld [vmem:[#allocation7 + $0x78] ss:$12 sps:$4 sm:$0xff]   ;;  %v850_v12 = vld [vmem:[#allocation7 + $0x80] ss:$12 sps:$4 sm:$0xff]  }
  0x44   :  { %325 = vmatprep.subr.bf16.mxu1 %v843_v7  ;;  %v847_v10 = vld [vmem:[#allocation7 + $0x7c] ss:$12 sps:$4 sm:$0xff]   ;;  %v851_v13 = vld [vmem:[#allocation7 + $0x64] ss:$12 sps:$4 sm:$0xff]   ;;  %v853_v14 = vld [vmem:[#allocation7 + $0x60] ss:$12 sps:$4 sm:$0xff]   ;;  %355 = vmatprep.mubr.bf16.mxu1 %v1046_v28 }
  0x45   :  { %780 = vmatmul.mubr.msk.bf16.vlgmr.msra.gmra.mxu0 %vm117_vm1, %v101_v3  ;;  %v854_v15 = vld [vmem:[#allocation7 + $0x68] ss:$12 sps:$4 sm:$0xff]   ;;  %v855_v16 = vld [vmem:[#allocation7 + $0x4c] ss:$12 sps:$4 sm:$0xff]   ;;  %v858_v18 = vld [vmem:[#allocation7 + $0x50] ss:$12 sps:$4 sm:$0xff]  }
  0x46   :  { %784 = vmatpush3.bf16.msra.mxu0 %v842_v6  ;;  %799 = vmatprep.mubr.msk.bf16.mxu0 %vm1045_vm0, %v1044_v0  ;;  %v857_v17 = vld [vmem:[#allocation7 + $0x48] ss:$12 sps:$4 sm:$0xff]   ;;  %v861_v20 = vld [vmem:[#allocation7 + $0x30] ss:$12 sps:$4 sm:$0xff]   ;;  %v862_v21 = vld [vmem:[#allocation7 + $0x38] ss:$12 sps:$4 sm:$0xff]  }
  0x47   :  { %785 = vmatprep.subr.bf16.mxu0 %v1044_v0  ;;  %326 = vmatpush1.bf16.msra.mxu1 %v845_v8  ;;  %v859_v19 = vld [vmem:[#allocation7 + $0x34] ss:$12 sps:$4 sm:$0xff]   ;;  %v863_v22 = vld [vmem:[#allocation7 + $0x1c] ss:$12 sps:$4 sm:$0xff]   ;;  %v865_v23 = vld [vmem:[#allocation7 + $0x18] ss:$12 sps:$4 sm:$0xff]  }
  0x48   :  { %327 = vmatprep.subr.bf16.mxu1 %v847_v10  ;;  %v866_v24 = vld [vmem:[#allocation7 + $0x20] ss:$12 sps:$4 sm:$0xff]   ;;  %v867_v25 = vld [vmem:[#allocation7 + $0x4] ss:$12 sps:$4 sm:$0xff]   ;;  %v870_v27 = vld [vmem:[#allocation7 + $0x8] ss:$12 sps:$4 sm:$0xff]  }
  0x49   :  { %v869_v26 = vld [vmem:[#allocation7] ss:$12 sps:$4 sm:$0xff]   ;;  %v873_v29 = vld [vmem:[#allocation8 + $0x74] ss:$8 sps:$4 sm:$0xff]   ;;  %v703_v30 = vld [vmem:[%s1159_s2] ss:$0 sm:$0xff] }
  0x4a   :  { %786 = vmatpush3.bf16.msra.mxu0 %v846_v9  ;;  %v871_v36 = vld [vmem:[#allocation8 + $0x70] ss:$8 sps:$4 sm:$0xff]   ;;  %v876_v38 = vld [vmem:[#allocation8 + $0x64] ss:$8 sps:$4 sm:$0xff]   ;;  %v874_v40 = vld [vmem:[#allocation8 + $0x60] ss:$8 sps:$4 sm:$0xff]  }
  0x4b   :  { %787 = vmatprep.subr.bf16.mxu0 %v1044_v0  ;;  %328 = vmatpush1.bf16.msra.mxu1 %v849_v11  ;;  %v879_v41 = vld [vmem:[#allocation8 + $0x54] ss:$8 sps:$4 sm:$0xff]   ;;  %v877_v42 = vld [vmem:[#allocation8 + $0x50] ss:$8 sps:$4 sm:$0xff]   ;;  %v882_v43 = vld [vmem:[#allocation8 + $0x44] ss:$8 sps:$4 sm:$0xff]  }
  0x4c   :  { %329 = vmatprep.subr.bf16.mxu1 %v851_v13  ;;  %v880_v44 = vld [vmem:[#allocation8 + $0x40] ss:$8 sps:$4 sm:$0xff]   ;;  %v885_v45 = vld [vmem:[#allocation8 + $0x34] ss:$8 sps:$4 sm:$0xff]   ;;  %v883_v46 = vld [vmem:[#allocation8 + $0x30] ss:$8 sps:$4 sm:$0xff]  }
  0x4d   :  { %v888_v47 = vld [vmem:[#allocation8 + $0x24] ss:$8 sps:$4 sm:$0xff]   ;;  %v886_v48 = vld [vmem:[#allocation8 + $0x20] ss:$8 sps:$4 sm:$0xff]   ;;  %v891_v49 = vld [vmem:[#allocation8 + $0x14] ss:$8 sps:$4 sm:$0xff]  }
  0x4e   :  { %788 = vmatpush3.bf16.msra.mxu0 %v850_v12  ;;  %v889_v50 = vld [vmem:[#allocation8 + $0x10] ss:$8 sps:$4 sm:$0xff]   ;;  %v894_v51 = vld [vmem:[#allocation8 + $0x4] ss:$8 sps:$4 sm:$0xff]   ;;  %v892_v52 = vld [vmem:[#allocation8] ss:$8 sps:$4 sm:$0xff]  }
  0x4f   :  { %789 = vmatprep.subr.bf16.mxu0 %v1044_v0  ;;  %330 = vmatpush1.bf16.msra.mxu1 %v853_v14  ;;  %v895_v53 = vld [vmem:[#allocation10 + $0x38] sm:$0xff]   ;;  %v896_v54 = vld [vmem:[#allocation10 + $0x30] sm:$0xff]   ;;  %v897_v55 = vld [vmem:[#allocation10 + $0x28] sm:$0xff]  }
  0x50   :  { %331 = vmatprep.subr.bf16.mxu1 %v855_v16  ;;  %v898_v56 = vld [vmem:[#allocation10 + $0x20] sm:$0xff]   ;;  %v730_v57 = vld [vmem:[%s1161_s4] ss:$0 sm:$0xff]  ;;  %v899_v10 = vld [vmem:[#allocation10 + $0x18] sm:$0xff]  }
  0x51   :  { %v900_v11 = vld [vmem:[#allocation10 + $0x10] sm:$0xff]   ;;  %v901_v12 = vld [vmem:[#allocation10 + $0x8] sm:$0xff]   ;;  %v902_v13 = vld [vmem:[#allocation10] sm:$0xff]  }
  0x52   :  { %790 = vmatpush3.bf16.msra.mxu0 %v854_v15  ;;  %v747_v15 = vld [vmem:[%s1163_s6] ss:$0 sm:$0xff]  ;;  %s1047_s6 = smov [#allocation11]  }
  0x53   :  { %791 = vmatprep.subr.bf16.mxu0 %v1044_v0  ;;  %332 = vmatpush1.bf16.msra.mxu1 %v857_v17  ;;  %s692_s20 = sshll.u32 %s1047_s6, 4  ;;  %s693_s20 = int_to_ptr.vmem [resolvable:$true] %s692_s20 }
  0x54   :  { %333 = vmatprep.subr.bf16.mxu1 %v859_v19  ;;  %s1005_s21 = scalar_lea.vmem %s693_s20, 128  ;;  %p1010_p12 = scmp.lt.s32.totalorder %s693_s20, %s693_s20 }
  0x55   :  { %p1006_p11 = scmp.ne.s32.totalorder %s693_s20, %s1005_s21  ;;  %p1011_p13 = scmp.lt.s32.totalorder %s1005_s21, %s1005_s21 }
  0x56   :  { %792 = vmatpush3.bf16.msra.mxu0 %v858_v18 }
  0x57   :  { %793 = vmatprep.subr.bf16.mxu0 %v1044_v0  ;;  %334 = vmatpush1.bf16.msra.mxu1 %v861_v20  ;;  %p1012_p0 = por %p1011_p13, %p1010_p12 }
  0x58   :  { %335 = vmatprep.subr.bf16.mxu1 %v863_v22 }
  0x59   :  { %p1013_p1 = pnand %p1012_p0, %p1006_p11 }
  0x5a   :  { %794 = vmatpush3.bf16.msra.mxu0 %v862_v21 }
  0x5b   :  { %795 = vmatprep.subr.bf16.mxu0 %v1044_v0  ;;  %336 = vmatpush1.bf16.msra.mxu1 %v865_v23 }
  0x5c   :  { %337 = vmatprep.subr.bf16.mxu1 %v867_v25 }
  0x5e   :  { %796 = vmatpush3.bf16.msra.mxu0 %v866_v24 }
  0x5f   :  { %797 = vmatprep.subr.bf16.mxu0 %v1044_v0  ;;  %338 = vmatpush1.bf16.msra.mxu1 %v869_v26 }
  0x60   :  { %514 = vmatprep.subr.bf16.mxu1 %v873_v29 }
  0x62   :  { %798 = vmatpush3.bf16.msra.mxu0 %v870_v27 }
  0x63   :  { %803 = vmatprep.subr.bf16.mxu0 %v1044_v0 }
 0x105   :  { %v155_v31 = vpop.f32.mrf.mxu0 }
 0x106   :  { %v156_v32 = vadd.f32 %v703_v30, %v155_v31 }
 0x107   :  { %v781_v33 = vpop.f32.mrf.mxu0 }
 0x108   :  { %v161_v34 = vmax.f32 %v156_v32, 0.0 }
 0x109   :  { %v158_v35 = vpop.f32.mrf.mxu0 }
 0x10a   :  { %v162_v37 = vpack.c.bf16 %v161_v34, %v161_v34 }
 0x10b   :  { %v782_v39 = vpop.f32.mrf.mxu0 }
 0x10c   :  { %356 = vmatmul.mubr.bf16.vlgmr.msra.gmra.mxu1 %v162_v37  ;;  %800 = vmatmul.mubr.bf16.vlgmr.msra.gmra.mxu0 %v162_v37 }
 0x10d   :  { %515 = vmatpush1.bf16.msra.mxu1 %v871_v36  ;;  %546 = vmatprep.mubr.bf16.mxu1 %v1046_v28  ;;  %v756_v28 = vld [vmem:[%s1165_s8] ss:$0 sm:$0xff] }
 0x10e   :  { %516 = vmatprep.subr.bf16.mxu1 %v876_v38  ;;  %819 = vmatprep.mubr.msk.bf16.mxu0 %vm1045_vm0, %v1044_v0 }
 0x10f   :  { %804 = vmatpush3.bf16.msra.mxu0 %v895_v53 }
 0x110   :  { %805 = vmatprep.subr.bf16.mxu0 %v1044_v0 }
 0x111   :  { %517 = vmatpush1.bf16.msra.mxu1 %v874_v40 }
 0x112   :  { %518 = vmatprep.subr.bf16.mxu1 %v879_v41 }
 0x113   :  { %806 = vmatpush3.bf16.msra.mxu0 %v896_v54 }
 0x114   :  { %807 = vmatprep.subr.bf16.mxu0 %v1044_v0 }
 0x115   :  { %519 = vmatpush1.bf16.msra.mxu1 %v877_v42 }
 0x116   :  { %520 = vmatprep.subr.bf16.mxu1 %v882_v43 }
 0x117   :  { %808 = vmatpush3.bf16.msra.mxu0 %v897_v55 }
 0x118   :  { %809 = vmatprep.subr.bf16.mxu0 %v1044_v0 }
 0x119   :  { %521 = vmatpush1.bf16.msra.mxu1 %v880_v44 }
 0x11a   :  { %522 = vmatprep.subr.bf16.mxu1 %v885_v45 }
 0x11b   :  { %810 = vmatpush3.bf16.msra.mxu0 %v898_v56 }
 0x11c   :  { %811 = vmatprep.subr.bf16.mxu0 %v1044_v0 }
 0x11d   :  { %523 = vmatpush1.bf16.msra.mxu1 %v883_v46 }
 0x11e   :  { %524 = vmatprep.subr.bf16.mxu1 %v888_v47 }
 0x11f   :  { %812 = vmatpush3.bf16.msra.mxu0 %v899_v10 }
 0x120   :  { %813 = vmatprep.subr.bf16.mxu0 %v1044_v0 }
 0x121   :  { %525 = vmatpush1.bf16.msra.mxu1 %v886_v48 }
 0x122   :  { %526 = vmatprep.subr.bf16.mxu1 %v891_v49 }
 0x123   :  { %814 = vmatpush3.bf16.msra.mxu0 %v900_v11 }
 0x124   :  { %815 = vmatprep.subr.bf16.mxu0 %v1044_v0 }
 0x125   :  { %527 = vmatpush1.bf16.msra.mxu1 %v889_v50 }
 0x126   :  { %528 = vmatprep.subr.bf16.mxu1 %v894_v51 }
 0x127   :  { %816 = vmatpush3.bf16.msra.mxu0 %v901_v12 }
 0x128   :  { %817 = vmatprep.subr.bf16.mxu0 %v1044_v0 }
 0x129   :  { %529 = vmatpush1.bf16.msra.mxu1 %v892_v52 }
 0x12b   :  { %818 = vmatpush3.bf16.msra.mxu0 %v902_v13 }
 0x1cc   :  { %v357_v58 = vpop.f32.mrf.mxu1  ;;  %v398_v59 = vpop.f32.mrf.mxu0 }
 0x1cd   :  { %v411_v60 = vadd.f32 %v730_v57, %v357_v58 }
 0x1ce   :  { %v359_v61 = vpop.f32.mrf.mxu1  ;;  %v801_v62 = vpop.f32.mrf.mxu0 }
 0x1cf   :  { %v412_v63 = vadd.f32 3.0, %v411_v60 }
 0x1d0   :  { %v361_v1 = vpop.f32.mrf.mxu1  ;;  %v401_v2 = vpop.f32.mrf.mxu0 }
 0x1d1   :  { %v413_v3 = vmax.f32 %v412_v63, 0.0 }
 0x1d2   :  { %v362_v4 = vpop.f32.mrf.mxu1  ;;  %v802_v5 = vpop.f32.mrf.mxu0 }
 0x1d3   :  { %v414_v6 = vmin.f32 %v413_v3, 6.0 }
 0x1d5   :  { %v415_v7 = vmul.f32 0.16666667, %v414_v6 }
 0x1d7   :  { %v416_v8 = vmul.f32 %v415_v7, %v411_v60 }
 0x1d9   :  { %v417_v9 = vpack.c.bf16 %v416_v8, %v416_v8 }
 0x1db   :  { %547 = vmatmul.mubr.bf16.vlgmr.msra.gmra.mxu1 %v417_v9 }
 0x29b   :  { %v548_v14 = vpop.f32.mrf.mxu1 }
 0x29c   :  { %v555_v16 = vadd.f32 %v548_v14, %v359_v61 }
 0x29d   :  { %v550_v17 = vpop.f32.mrf.mxu1 }
 0x29e   :  { %v563_v18 = vadd.f32 %v747_v15, %v555_v16  ;;  %v674_v0 = vadd.f32 %v550_v17, %v398_v59 }
 0x29f   :  { %v552_v19 = vpop.f32.mrf.mxu1 }
 0x2a0   :  { %v564_v20 = vadd.f32 3.0, %v563_v18 }
 0x2a1   :  { %v553_v21 = vpop.f32.mrf.mxu1 }
 0x2a2   :  { %v565_v22 = vmax.f32 %v564_v20, 0.0 }
 0x2a4   :  { %v566_v23 = vmin.f32 %v565_v22, 6.0 }
 0x2a6   :  { %v567_v24 = vmul.f32 0.16666667, %v566_v23 }
 0x2a8   :  { %v568_v25 = vmul.f32 %v567_v24, %v563_v18 }
 0x2aa   :  { %v569_v26 = vpack.c.bf16 %v568_v25, %v568_v25 }
 0x2ac   :  { %820 = vmatmul.mubr.bf16.vlgmr.msra.gmra.mxu0 %v569_v26 }
 0x36c   :  { %v668_v27 = vpop.f32.mrf.mxu0 }
 0x36d   :  { %v675_v29 = vadd.f32 %v674_v0, %v668_v27 }
 0x36e   :  { %v821_v30 = vpop.f32.mrf.mxu0 }
 0x36f   :  { %v683_v31 = vadd.f32 %v756_v28, %v675_v29 }
 0x370   :  { %v671_v32 = vpop.f32.mrf.mxu0 }
 0x371   :  { %903 = vtanh.f32 %v683_v31 }
 0x372   :  { %v822_v33 = vpop.f32.mrf.mxu0 }
 0x37e   :  { %v904_v34 = vpop.eup %903 }
 0x37f   :  { %685 = vst [vmem:[#allocation11] sm:$0xff] %v904_v34 }
 0x380   :  { %1016 = shalt.err (!%p1013_p1)
}
 0x381   :  { %695 = dma.vmem_to_hbm [thread:$0]  %s693_s20, 128, %s1166_s9, [#allocation4]  }
 0x382   :  { %1031 = dma.done.wait [#allocation4], 128  }
 0x383   :  { %1032 = vsyncadd [#allocation4], 4294967168 }
 0x384   :  { %699 = vsyncpa [#allocation3], 1 }
 0x385   :  { %700 = vsyncpa [#allocation6], 1 }
 0x386   :  { %701 = vsyncpa [#allocation9], 1 }
 0x387   :  { %702 = vsyncpa [#allocation4], 1 }

</bundles_post_ra>
